<compile_context>
chip_gen: v7x
topology: tpu7x:2x2x1
jax: 0.10.0
libtpu: 0.0.40
codegen_flags: <defaults>
</compile_context>

<pallas_src>
import functools
import math

import jax
import jax.numpy as jnp
from jax import lax
from jax.experimental import pallas as pl
from jax.experimental.pallas import tpu as pltpu


def _round_up(n: int, m: int) -> int:
    return ((n + m - 1) // m) * m


def _layernorm_kernel(x_ref, g_ref, b_ref, o_ref, *, eps: float):
    # x_ref: (TM, D), g_ref/b_ref: (1, D), o_ref: (TM, D)
    x = x_ref[...].astype(jnp.float32)
    d = x.shape[-1]
    mean = jnp.mean(x, axis=-1, keepdims=True)
    diff = x - mean
    # torch.Tensor.std defaults to the unbiased estimator (divide by D-1);
    # the spec then computes (x - mean) / sqrt(std**2 + eps).
    denom = float(max(d - 1, 1))
    var = jnp.sum(diff * diff, axis=-1, keepdims=True) / denom
    inv = lax.rsqrt(var + eps)  # EUP rsqrt, off the VALU critical path
    x_z = diff * inv
    o_ref[...] = (g_ref[...] * x_z + b_ref[...]).astype(o_ref.dtype)


def layernorm_forward(x, gamma, beta, *, eps: float = 1e-6, tm_max: int = 256):
    """LayerNorm over the last axis of x with PyTorch Encoder.norm semantics.

    x: (..., d_model); gamma/beta: (d_model,).
    """
    orig_shape = x.shape
    d = orig_shape[-1]
    M = int(math.prod(orig_shape[:-1]))

    x2 = x.reshape(M, d)
    g2 = gamma.reshape(1, d).astype(jnp.float32)
    b2 = beta.reshape(1, d).astype(jnp.float32)

    # Large row tile (multiple of 8); pad rows instead of asserting divisibility.
    tm = min(tm_max, _round_up(M, 8))
    Mp = _round_up(M, tm)
    if Mp != M:
        x2 = jnp.pad(x2, ((0, Mp - M), (0, 0)))

    cost = pl.CostEstimate(
        flops=8 * Mp * d,
        transcendentals=Mp,  # one rsqrt per row
        bytes_accessed=(2 * Mp * d + 2 * d) * 4,
    )

    out = pl.pallas_call(
        functools.partial(_layernorm_kernel, eps=float(eps)),
        out_shape=jax.ShapeDtypeStruct((Mp, d), x.dtype),
        grid_spec=pltpu.PrefetchScalarGridSpec(
            num_scalar_prefetch=0,
            grid=(Mp // tm,),
            in_specs=[
                pl.BlockSpec((tm, d), lambda i: (i, 0)),   # row tile of x
                pl.BlockSpec((1, d), lambda i: (0, 0)),    # gamma (a_2)
                pl.BlockSpec((1, d), lambda i: (0, 0)),    # beta  (b_2)
            ],
            out_specs=pl.BlockSpec((tm, d), lambda i: (i, 0)),
        ),
        compiler_params=pltpu.CompilerParams(
            dimension_semantics=("parallel",),
        ),
        cost_estimate=cost,
    )(x2, g2, b2)

    if Mp != M:
        out = out[:M]
    return out.reshape(orig_shape)


def encoder_forward(x, mask, layer_fns, gamma, beta, *, eps: float = 1e-6):
    """Encoder.forward: pass x (and mask) through each layer, then LayerNorm."""
    for layer_fn in layer_fns:
        x = layer_fn(x, mask)
    return layernorm_forward(x, gamma, beta, eps=eps)


if __name__ == "__main__":
    # Small shapes consistent with Encoder(layer, N): (batch, seq, d_model)
    batch, seq, d_model, n_layers = 2, 8, 32, 2
    eps = 1e-6

    key = jax.random.PRNGKey(0)
    kx, kg, kb = jax.random.split(key, 3)

    x = jax.random.normal(kx, (batch, seq, d_model), dtype=jnp.float32)
    mask = jnp.ones((batch, 1, seq), dtype=jnp.float32)
    # LayerNorm params (a_2 init=ones, b_2 init=zeros in the spec; randomized
    # here so the affine part of the kernel is actually exercised).
    gamma = 1.0 + 0.1 * jax.random.normal(kg, (d_model,), dtype=jnp.float32)
    beta = 0.1 * jax.random.normal(kb, (d_model,), dtype=jnp.float32)

    # TODO(synk): the EncoderLayer (self-attn + feed-forward sublayers) is not
    # defined in the provided spec; Encoder is generic over `layer`, so layers
    # are opaque callables here (identity stand-ins for the demo).
    layers = [lambda h, m: h for _ in range(n_layers)]

    out = encoder_forward(x, mask, layers, gamma, beta, eps=eps)
    out = jax.block_until_ready(out)

    # Pure-JAX reference with identical (PyTorch) semantics: unbiased std + eps.
    h = x
    for f in layers:
        h = f(h, mask)
    mean = h.mean(-1, keepdims=True)
    var = jnp.sum((h - mean) ** 2, axis=-1, keepdims=True) / (d_model - 1)
    ref = gamma * (h - mean) / jnp.sqrt(var + eps) + beta

    assert out.shape == (batch, seq, d_model)
    assert jnp.allclose(out, ref, atol=1e-5, rtol=1e-5)

    print("KERNEL_OK")
</pallas_src>

<mosaic_0001>
module attributes {stable_mosaic.version = 11 : i64} {
  func.func @_layernorm_kernel(%arg0: i32, %arg1: memref<16x32xf32, #tpu.memory_space<vmem>>, %arg2: memref<1x32xf32, #tpu.memory_space<vmem>>, %arg3: memref<1x32xf32, #tpu.memory_space<vmem>>, %arg4: memref<16x32xf32, #tpu.memory_space<vmem>>) attributes {dimension_semantics = [#tpu.dimension_semantics<parallel>], iteration_bounds = array<i64: 1>, scalar_prefetch = 0 : i64, scratch_operands = 0 : i64, tpu.core_type = #tpu.core_type<tc>, window_params = [{transform_indices = @transform_0, window_bounds = array<i64: 16, 32>}, {pipeline_mode = #tpu.pipeline_mode<synchronous>, transform_indices = @transform_1, window_bounds = array<i64: 1, 32>}, {pipeline_mode = #tpu.pipeline_mode<synchronous>, transform_indices = @transform_2, window_bounds = array<i64: 1, 32>}, {transform_indices = @transform_3, window_bounds = array<i64: 16, 32>}]} {
    %c0 = arith.constant 0 : index
    %c0_0 = arith.constant 0 : index
    %0 = vector.load %arg1[%c0, %c0_0] : memref<16x32xf32, #tpu.memory_space<vmem>>, vector<16x32xf32>
    %cst = arith.constant dense<0.000000e+00> : vector<16xf32>
    %1 = vector.multi_reduction <add>, %0, %cst [1] : vector<16x32xf32> to vector<16xf32>
    %2 = vector.shape_cast %1 : vector<16xf32> to vector<16x1xf32>
    %cst_1 = arith.constant 3.200000e+01 : f32
    %3 = vector.broadcast %cst_1 : f32 to vector<16x1xf32>
    %4 = arith.divf %2, %3 : vector<16x1xf32>
    %5 = vector.broadcast %4 : vector<16x1xf32> to vector<16x32xf32>
    %6 = arith.subf %0, %5 : vector<16x32xf32>
    %7 = arith.mulf %6, %6 : vector<16x32xf32>
    %cst_2 = arith.constant dense<0.000000e+00> : vector<16xf32>
    %8 = vector.multi_reduction <add>, %7, %cst_2 [1] : vector<16x32xf32> to vector<16xf32>
    %9 = vector.shape_cast %8 : vector<16xf32> to vector<16x1xf32>
    %cst_3 = arith.constant 3.100000e+01 : f32
    %10 = vector.broadcast %cst_3 : f32 to vector<16x1xf32>
    %11 = arith.divf %9, %10 : vector<16x1xf32>
    %cst_4 = arith.constant 9.99999997E-7 : f32
    %12 = vector.broadcast %cst_4 : f32 to vector<16x1xf32>
    %13 = arith.addf %11, %12 : vector<16x1xf32>
    %14 = math.rsqrt %13 : vector<16x1xf32>
    %15 = vector.broadcast %14 : vector<16x1xf32> to vector<16x32xf32>
    %16 = arith.mulf %6, %15 : vector<16x32xf32>
    %c0_5 = arith.constant 0 : index
    %c0_6 = arith.constant 0 : index
    %17 = vector.load %arg2[%c0_5, %c0_6] : memref<1x32xf32, #tpu.memory_space<vmem>>, vector<1x32xf32>
    %18 = vector.broadcast %17 : vector<1x32xf32> to vector<16x32xf32>
    %19 = arith.mulf %18, %16 : vector<16x32xf32>
    %c0_7 = arith.constant 0 : index
    %c0_8 = arith.constant 0 : index
    %20 = vector.load %arg3[%c0_7, %c0_8] : memref<1x32xf32, #tpu.memory_space<vmem>>, vector<1x32xf32>
    %21 = vector.broadcast %20 : vector<1x32xf32> to vector<16x32xf32>
    %22 = arith.addf %19, %21 : vector<16x32xf32>
    %c0_9 = arith.constant 0 : index
    %c0_10 = arith.constant 0 : index
    %23 = vector.load %arg4[%c0_9, %c0_10] : memref<16x32xf32, #tpu.memory_space<vmem>>, vector<16x32xf32>
    tpu.vector_store %arg4[%c0_9, %c0_10], %22 {strides = array<i32>} : memref<16x32xf32, #tpu.memory_space<vmem>>, vector<16x32xf32>,
    return
  }
  func.func @transform_0(%arg0: i32) -> (i32, i32) {
    %c0_i32 = arith.constant 0 : i32
    %c0_i32_0 = arith.constant 0 : i32
    return %arg0, %c0_i32 : i32, i32
  }
  func.func @transform_1(%arg0: i32) -> (i32, i32) {
    %c0_i32 = arith.constant 0 : i32
    %c0_i32_0 = arith.constant 0 : i32
    %c0_i32_1 = arith.constant 0 : i32
    return %c0_i32, %c0_i32_0 : i32, i32
  }
  func.func @transform_2(%arg0: i32) -> (i32, i32) {
    %c0_i32 = arith.constant 0 : i32
    %c0_i32_0 = arith.constant 0 : i32
    %c0_i32_1 = arith.constant 0 : i32
    return %c0_i32, %c0_i32_0 : i32, i32
  }
  func.func @transform_3(%arg0: i32) -> (i32, i32) {
    %c0_i32 = arith.constant 0 : i32
    %c0_i32_0 = arith.constant 0 : i32
    return %arg0, %c0_i32 : i32, i32
  }
}

</mosaic_0001>

<bundles_post_ra>
// kernel: tpu_custom_call.1
= control target key start
LH: loop header
LB: loop body
LE: loop exit
PB: predicated region body
PF: predicated region fallthrough
CT: control target
= control target key end

     0   :  { %8 = vsyncpa [#allocation3], 0  ;;  %s221_s0 = inlined_call_operand.hbm [shape: f32[16,32], index: 0, kind: input, shape index: {}]   ;;  %s222_s1 = inlined_call_operand.vmem [shape: f32[1,32], index: 1, kind: input, shape index: {}]   ;;  %s223_s2 = inlined_call_operand.vmem [shape: f32[1,32], index: 2, kind: input, shape index: {}]   ;;  %s224_s3 = inlined_call_operand.hbm [shape: f32[16,32], index: 3, kind: output, shape index: {}]  }
   0x1   :  { %9 = vsyncpa [#allocation4], 0  ;;  %s155_s12 = smov [#allocation2]   ;;  %s107_s16 = scalar_lea.hbm %s221_s0, 256 }
   0x2   :  { %s15_s13 = sshll.u32 %s155_s12, 4  ;;  %p108_p0 = scmp.ne.s32.totalorder %s221_s0, %s107_s16  ;;  %s16_s13 = int_to_ptr.vmem [resolvable:$true] %s15_s13 }
   0x3   :  { %p111_p1 = scmp.lt.u32.totalorder %s107_s16, %s221_s0 }
   0x5   :  { %p113_p2 = pnand %p111_p1, %p108_p0 }
   0x7   :  { %116 = shalt.err (!%p113_p2)
}
   0x8   :  { %s117_s21 = scalar_lea.vmem %s16_s13, 256  ;;  %p122_p4 = scmp.lt.s32.totalorder %s16_s13, %s16_s13 }
   0x9   :  { %p118_p3 = scmp.ne.s32.totalorder %s16_s13, %s117_s21  ;;  %p123_p5 = scmp.lt.s32.totalorder %s117_s21, %s117_s21 }
   0xb   :  { %p124_p6 = por %p123_p5, %p122_p4 }
   0xd   :  { %p125_p7 = pnand %p124_p6, %p118_p3 }
   0xf   :  { %128 = shalt.err (!%p125_p7)
}
  0x10   :  { %s156_s22 = smov 128   ;;  %s157_s23 = smov 8  }
  0x11   :  { %21 = dma.hbm_to_vmem [thread:$0]  %s221_s0, 256, %s16_s13, [#allocation3], %s156_s22, %s156_s22, %s157_s23  }
  0x12   :  { %151 = dma.done.wait [#allocation3], 256  }
  0x13   :  { %152 = vsyncadd [#allocation3], 4294967040  ;;  %vm31_vm0 = vcmask 261120   ;;  %v29_v0 = vld [vmem:[#allocation2] sm:$0xff]  ;;  %v30_v1 = vld [vmem:[#allocation2 + $0x8] sm:$0xff]  ;;  %s158_s29 = smov [#allocation5]  }
  0x14   :  { %v32_v2 = vsel %vm31_vm0, %v29_v0, 0.0  ;;  %v35_v3 = vsel %vm31_vm0, %v30_v1, 0.0  ;;  %v97_v21 = vld [vmem:[%s222_s1] ss:$0 sm:$0xff]  ;;  %s85_s30 = sshll.u32 %s158_s29, 4  ;;  %s86_s30 = int_to_ptr.vmem [resolvable:$true] %s85_s30 }
  0x15   :  { %33 = vadd.xlane.f32.xlu0 %v32_v2  ;;  %v98_v23 = vld [vmem:[%s223_s2] ss:$0 sm:$0xff]  ;;  %s129_s4 = scalar_lea.vmem %s86_s30, 256  ;;  %p134_p9 = scmp.lt.s32.totalorder %s86_s30, %s86_s30 }
  0x16   :  { %p130_p8 = scmp.ne.s32.totalorder %s86_s30, %s129_s4  ;;  %p135_p10 = scmp.lt.s32.totalorder %s129_s4, %s129_s4 }
  0x18   :  { %p136_p11 = por %p135_p10, %p134_p9 }
  0x19   :  { %36 = vadd.xlane.f32.xlu0 %v35_v3 }
  0x1a   :  { %p137_p12 = pnand %p136_p11, %p130_p8 }
  0xa2   :  { %v34_v4 = vpop.xlane.xlu0 %33 }
  0xa3   :  { %v39_v5 = vmul.f32 0.03125, %v34_v4 }
  0xa5   :  { %v41_v6 = vsub.f32 %v29_v0, %v39_v5 }
  0xa6   :  { %v37_v7 = vpop.xlane.xlu0 %36 }
  0xa7   :  { %v40_v8 = vmul.f32 0.03125, %v37_v7  ;;  %v43_v9 = vmul.f32 %v41_v6, %v41_v6 }
  0xa9   :  { %v42_v10 = vsub.f32 %v30_v1, %v40_v8  ;;  %v45_v11 = vsel %vm31_vm0, %v43_v9, 0.0 }
  0xaa   :  { %46 = vadd.xlane.f32.xlu1 %v45_v11 }
  0xab   :  { %v44_v12 = vmul.f32 %v42_v10, %v42_v10 }
  0xad   :  { %v48_v13 = vsel %vm31_vm0, %v44_v12, 0.0 }
  0xae   :  { %49 = vadd.xlane.f32.xlu1 %v48_v13 }
 0x137   :  { %v47_v14 = vpop.xlane.xlu1 %46 }
 0x138   :  { %v52_v15 = vmul.f32 0.032258064, %v47_v14 }
 0x13a   :  { %v54_v16 = vadd.f32 1e-06, %v52_v15 }
 0x13b   :  { %v50_v17 = vpop.xlane.xlu1 %49 }
 0x13c   :  { %103 = vrsqrt.f32 %v54_v16  ;;  %v53_v18 = vmul.f32 0.032258064, %v50_v17 }
 0x13e   :  { %v55_v19 = vadd.f32 1e-06, %v53_v18 }
 0x140   :  { %105 = vrsqrt.f32 %v55_v19 }
 0x146   :  { %v104_v20 = vpop.eup %103 }
 0x147   :  { %v58_v22 = vmul.f32 %v104_v20, %v41_v6 }
 0x149   :  { %v67_v24 = vmul.f32 %v97_v21, %v58_v22 }
 0x14a   :  { %v106_v25 = vpop.eup %105 }
 0x14b   :  { %v59_v26 = vmul.f32 %v106_v25, %v42_v10  ;;  %v76_v27 = vadd.f32 %v98_v23, %v67_v24 }
 0x14d   :  { %v68_v28 = vmul.f32 %v97_v21, %v59_v26  ;;  %78 = vst.msk [vmem:[#allocation5] sm:$0xff] %vm31_vm0, %v76_v27 }
 0x14f   :  { %v77_v29 = vadd.f32 %v98_v23, %v68_v28 }
 0x151   :  { %79 = vst.msk [vmem:[#allocation5 + $0x8] sm:$0xff] %vm31_vm0, %v77_v29 }
 0x152   :  { %140 = shalt.err (!%p137_p12)
}
 0x153   :  { %s141_s5 = scalar_lea.hbm %s224_s3, 256 }
 0x154   :  { %p142_p13 = scmp.ne.s32.totalorder %s224_s3, %s141_s5  ;;  %p145_p0 = scmp.lt.u32.totalorder %s141_s5, %s224_s3 }
 0x156   :  { %p147_p1 = pnand %p145_p0, %p142_p13 }
 0x158   :  { %150 = shalt.err (!%p147_p1)
}
 0x159   :  { %91 = dma.vmem_to_hbm [thread:$0]  %s86_s30, 256, %s224_s3, [#allocation4], %s156_s22, %s156_s22, %s157_s23  }
 0x15a   :  { %153 = dma.done.wait [#allocation4], 256  }
 0x15b   :  { %154 = vsyncadd [#allocation4], 4294967040 }
 0x15c   :  { %95 = vsyncpa [#allocation3], 1 }
 0x15d   :  { %96 = vsyncpa [#allocation4], 1 }

</bundles_post_ra>
